<compile_context>
chip_gen: v6e
topology: v6e:2x2x1
jax: 0.10.0
libtpu: 0.0.40
codegen_flags: <defaults>
</compile_context>

<pallas_src>
import functools

import jax
import jax.numpy as jnp
from jax.experimental import pallas as pl
from jax.experimental.pallas import tpu as pltpu

EPS = 1e-5


def _round_up(x, m):
    return ((x + m - 1) // m) * m


# ----------------------------------------------------------------------------
# Pallas kernel: fused 3x3 conv (BN folded) + bias + ReLU over one flat-M tile.
# ----------------------------------------------------------------------------
def _conv_bn_relu_kernel(xg_ref, wg_ref, bias_ref, o_ref, *, stride, wo, tm):
    # xg_ref  : (s, 1, L, 3*Cp)  bf16  -- phase/kw-folded padded input (full image)
    # wg_ref  : (3, 3*Cp, Np)    bf16  -- per-kh BN-folded weights
    # bias_ref: (1, Np)          f32   -- conv bias folded through BN
    # o_ref   : (1, TM, Np)      f32
    j = pl.program_id(1)
    m0 = pl.multiple_of(j * tm, 8)
    np_ = o_ref.shape[-1]
    acc = jnp.zeros((tm, np_), jnp.float32)
    for kh in range(3):  # static unroll -> 3 accumulated MXU matmuls
        start = m0 + (kh // stride) * wo
        a = xg_ref[kh % stride, 0, pl.ds(start, tm), :]          # (TM, 3*Cp) bf16
        acc = acc + jnp.dot(a, wg_ref[kh],
                            preferred_element_type=jnp.float32)  # (TM, Np) f32
    out = jnp.maximum(acc + bias_ref[...], 0.0)
    o_ref[...] = out.reshape(1, tm, np_)


# ----------------------------------------------------------------------------
# JAX glue: BN folding and the one-shot polyphase/kw-fold input packing.
# ----------------------------------------------------------------------------
def _fold_bn(p, cin_pad, cout_pad):
    w, b = p["w"], p["b"]                      # (Cout, Cin, 3, 3), (Cout,)
    cout, cin = w.shape[0], w.shape[1]
    scale = p["gamma"] / jnp.sqrt(p["var"] + EPS)
    bias = p["beta"] - p["mean"] * scale + b * scale
    # (Cout, Cin, kh, kw) -> (kh, kw, Cin, Cout), BN scale folded into weights.
    wt = jnp.transpose(w, (2, 3, 1, 0)) * scale[None, None, None, :]
    wg = jnp.zeros((3, 3, cin_pad, cout_pad), jnp.float32)
    wg = wg.at[:, :, :cin, :cout].set(wt)
    wg = wg.reshape(3, 3 * cin_pad, cout_pad).astype(jnp.bfloat16)
    bias_p = jnp.zeros((1, cout_pad), jnp.float32).at[0, :cout].set(bias)
    return wg, bias_p


def _phase_pack_input(x_nhwc, stride, ho, wo, m_pad, cin_pad):
    """x NHWC -> (s, N, L, 3*cin_pad) bf16 with
       out[ph, n, i*wo + c, kw*cin_pad + ci] = x_pad[n, s*i + ph, kw + s*c, ci]."""
    n, h, w, cin = x_nhwc.shape
    s = stride
    lq = m_pad + (2 // s) * wo               # max flat row the kernel may touch
    hq = -(-lq // wo)                        # ceil(lq / wo) phase rows
    h_ext = max(s * hq, h + 2)
    w_ext = max(2 + s * wo, w + 2)
    xp = jnp.zeros((n, h_ext, w_ext, cin_pad), jnp.float32)
    xp = xp.at[:, 1:h + 1, 1:w + 1, :cin].set(x_nhwc)   # conv zero padding
    # fold the 3 kw taps into the channel axis (W already subsampled by stride)
    xkw = jnp.concatenate(
        [xp[:, :, kw:kw + s * wo:s, :] for kw in range(3)], axis=-1)
    # split H into its `s` stride phases
    xg = jnp.stack([xkw[:, ph::s, :, :][:, :hq] for ph in range(s)], axis=0)
    return xg.reshape(s, n, hq * wo, 3 * cin_pad).astype(jnp.bfloat16)


# ----------------------------------------------------------------------------
# ConvBatchNorm forward
# ----------------------------------------------------------------------------
@functools.partial(jax.jit, static_argnames=("stride",))
def conv_batch_norm(x_nchw, params, stride):
    """ConvBatchNorm.forward: conv3x3(stride, pad=1, bias) -> BN (eval) -> ReLU.
    x: NCHW, returns NCHW."""
    n, cin, h, w = x_nchw.shape
    cout = params["w"].shape[0]
    ho = (h + 2 - 3) // stride + 1
    wo = (w + 2 - 3) // stride + 1
    m = ho * wo

    cin_pad = _round_up(cin, 8)
    cout_pad = _round_up(cout, 128)          # lane-dense output stores
    tm = min(_round_up(m, 8), 128)           # adaptive M tile, multiple of 8
    m_pad = _round_up(m, tm)
    n_tiles = m_pad // tm

    x = jnp.transpose(x_nchw, (0, 2, 3, 1)).astype(jnp.float32)   # NHWC
    xg = _phase_pack_input(x, stride, ho, wo, m_pad, cin_pad)
    wg, bias = _fold_bn(params, cin_pad, cout_pad)
    l = xg.shape[2]

    kernel = functools.partial(_conv_bn_relu_kernel,
                               stride=stride, wo=wo, tm=tm)
    out = pl.pallas_call(
        kernel,
        out_shape=jax.ShapeDtypeStruct((n, m_pad, cout_pad), jnp.float32),
        grid=(n, n_tiles),
        in_specs=[
            # full phase-packed image per batch element (re-used across M tiles)
            pl.BlockSpec((stride, 1, l, 3 * cin_pad), lambda b, j: (0, b, 0, 0)),
            pl.BlockSpec((3, 3 * cin_pad, cout_pad), lambda b, j: (0, 0, 0)),
            pl.BlockSpec((1, cout_pad), lambda b, j: (0, 0)),
        ],
        out_specs=pl.BlockSpec((1, tm, cout_pad), lambda b, j: (b, j, 0)),
        compiler_params=pltpu.CompilerParams(
            dimension_semantics=("parallel", "parallel")),
    )(xg, wg, bias)

    out = out[:, :m, :cout].reshape(n, ho, wo, cout)   # drop M/Cout padding
    return jnp.transpose(out, (0, 3, 1, 2))            # back to NCHW


# ----------------------------------------------------------------------------
# Deterministic parameters + pure-JAX reference (for correctness checking)
# ----------------------------------------------------------------------------
def init_conv_bn_params(key, cin, cout):
    kw, kb, kg, kbt, km, kv = jax.random.split(key, 6)
    return dict(
        w=0.05 * jax.random.normal(kw, (cout, cin, 3, 3), jnp.float32),
        b=0.05 * jax.random.normal(kb, (cout,), jnp.float32),
        gamma=jax.random.uniform(kg, (cout,), jnp.float32, 0.5, 1.5),
        beta=0.1 * jax.random.normal(kbt, (cout,), jnp.float32),
        mean=0.1 * jax.random.normal(km, (cout,), jnp.float32),
        var=jax.random.uniform(kv, (cout,), jnp.float32, 0.5, 1.5),
    )


def reference_conv_bn(x_nchw, p, stride):
    out = jax.lax.conv_general_dilated(
        x_nchw, p["w"], window_strides=(stride, stride),
        padding=((1, 1), (1, 1)),
        dimension_numbers=("NCHW", "OIHW", "NCHW"))
    out = out + p["b"][None, :, None, None]
    scale = (p["gamma"] / jnp.sqrt(p["var"] + EPS))[None, :, None, None]
    out = (out - p["mean"][None, :, None, None]) * scale \
        + p["beta"][None, :, None, None]
    return jnp.maximum(out, 0.0)


if __name__ == "__main__":
    key = jax.random.PRNGKey(0)
    kx, k1, k2 = jax.random.split(key, 3)

    x = jax.random.normal(kx, (2, 4, 16, 16), jnp.float32)   # NCHW like PyTorch

    # ConvBatchNorm(input=4, output=32, stride=2)
    p1 = init_conv_bn_params(k1, 4, 32)
    out1 = jax.block_until_ready(conv_batch_norm(x, p1, stride=2))
    assert out1.shape == (2, 32, 8, 8), out1.shape
    assert bool(jnp.all(jnp.isfinite(out1)))
    err1 = float(jnp.max(jnp.abs(out1 - reference_conv_bn(x, p1, 2))))
    assert err1 < 0.1, f"stride-2 mismatch vs reference: {err1}"

    # ConvBatchNorm(input=4, output=64, stride=1)
    p2 = init_conv_bn_params(k2, 4, 64)
    out2 = jax.block_until_ready(conv_batch_norm(x, p2, stride=1))
    assert out2.shape == (2, 64, 16, 16), out2.shape
    assert bool(jnp.all(jnp.isfinite(out2)))
    err2 = float(jnp.max(jnp.abs(out2 - reference_conv_bn(x, p2, 1))))
    assert err2 < 0.1, f"stride-1 mismatch vs reference: {err2}"

    print("KERNEL_OK")
</pallas_src>

<mosaic_0001>
module attributes {stable_mosaic.version = 11 : i64} {
  func.func @_conv_bn_relu_kernel(%arg0: i32, %arg1: i32, %arg2: memref<2x1x72x24xbf16, #tpu.memory_space<vmem>>, %arg3: memref<3x24x128xbf16, #tpu.memory_space<vmem>>, %arg4: memref<1x128xf32, #tpu.memory_space<vmem>>, %arg5: memref<1x64x128xf32, #tpu.memory_space<vmem>>) attributes {dimension_semantics = [#tpu.dimension_semantics<parallel>, #tpu.dimension_semantics<parallel>], iteration_bounds = array<i64: 2, 1>, scalar_prefetch = 0 : i64, scratch_operands = 0 : i64, tpu.core_type = #tpu.core_type<tc>, window_params = [{transform_indices = @transform_0, window_bounds = array<i64: 2, 1, 72, 24>}, {pipeline_mode = #tpu.pipeline_mode<synchronous>, transform_indices = @transform_1, window_bounds = array<i64: 3, 24, 128>}, {pipeline_mode = #tpu.pipeline_mode<synchronous>, transform_indices = @transform_2, window_bounds = array<i64: 1, 128>}, {transform_indices = @transform_3, window_bounds = array<i64: 1, 64, 128>}]} {
    %c64_i32 = arith.constant 64 : i32
    %0 = arith.muli %arg1, %c64_i32 : i32
    %1 = tpu.assume_multiple %0, 8 : i32
    %cst = arith.constant 0.000000e+00 : f32
    %2 = vector.broadcast %cst : f32 to vector<64x128xf32>
    %c0_i32 = arith.constant 0 : i32
    %3 = arith.addi %1, %c0_i32 : i32
    %c0 = arith.constant 0 : index
    %c0_0 = arith.constant 0 : index
    %4 = arith.index_cast %3 : i32 to index
    %c0_1 = arith.constant 0 : index
    %5 = vector.load %arg2[%c0, %c0_0, %4, %c0_1] : memref<2x1x72x24xbf16, #tpu.memory_space<vmem>>, vector<1x1x64x24xbf16>
    %6 = vector.shape_cast %5 : vector<1x1x64x24xbf16> to vector<64x24xbf16>
    %c0_2 = arith.constant 0 : index
    %c0_3 = arith.constant 0 : index
    %c0_4 = arith.constant 0 : index
    %7 = vector.load %arg3[%c0_2, %c0_3, %c0_4] : memref<3x24x128xbf16, #tpu.memory_space<vmem>>, vector<1x24x128xbf16>
    %8 = vector.shape_cast %7 : vector<1x24x128xbf16> to vector<24x128xbf16>
    %cst_5 = arith.constant dense<0.000000e+00> : vector<64x128xf32>
    %9 = tpu.matmul %6, %8, %cst_5 {dimension_numbers = #tpu.dot_dimension_numbers<[1], [0], [0], [1], [0, 0, 1, 1], [], []>} : vector<64x24xbf16>, vector<24x128xbf16>, vector<64x128xf32> -> vector<64x128xf32>
    %10 = arith.addf %2, %9 : vector<64x128xf32>
    %c0_i32_6 = arith.constant 0 : i32
    %11 = arith.addi %1, %c0_i32_6 : i32
    %c1 = arith.constant 1 : index
    %c0_7 = arith.constant 0 : index
    %12 = arith.index_cast %11 : i32 to index
    %c0_8 = arith.constant 0 : index
    %13 = vector.load %arg2[%c1, %c0_7, %12, %c0_8] : memref<2x1x72x24xbf16, #tpu.memory_space<vmem>>, vector<1x1x64x24xbf16>
    %14 = vector.shape_cast %13 : vector<1x1x64x24xbf16> to vector<64x24xbf16>
    %c1_9 = arith.constant 1 : index
    %c0_10 = arith.constant 0 : index
    %c0_11 = arith.constant 0 : index
    %15 = vector.load %arg3[%c1_9, %c0_10, %c0_11] : memref<3x24x128xbf16, #tpu.memory_space<vmem>>, vector<1x24x128xbf16>
    %16 = vector.shape_cast %15 : vector<1x24x128xbf16> to vector<24x128xbf16>
    %cst_12 = arith.constant dense<0.000000e+00> : vector<64x128xf32>
    %17 = tpu.matmul %14, %16, %cst_12 {dimension_numbers = #tpu.dot_dimension_numbers<[1], [0], [0], [1], [0, 0, 1, 1], [], []>} : vector<64x24xbf16>, vector<24x128xbf16>, vector<64x128xf32> -> vector<64x128xf32>
    %18 = arith.addf %10, %17 : vector<64x128xf32>
    %c8_i32 = arith.constant 8 : i32
    %19 = arith.addi %1, %c8_i32 : i32
    %c0_13 = arith.constant 0 : index
    %c0_14 = arith.constant 0 : index
    %20 = arith.index_cast %19 : i32 to index
    %c0_15 = arith.constant 0 : index
    %21 = vector.load %arg2[%c0_13, %c0_14, %20, %c0_15] : memref<2x1x72x24xbf16, #tpu.memory_space<vmem>>, vector<1x1x64x24xbf16>
    %22 = vector.shape_cast %21 : vector<1x1x64x24xbf16> to vector<64x24xbf16>
    %c2 = arith.constant 2 : index
    %c0_16 = arith.constant 0 : index
    %c0_17 = arith.constant 0 : index
    %23 = vector.load %arg3[%c2, %c0_16, %c0_17] : memref<3x24x128xbf16, #tpu.memory_space<vmem>>, vector<1x24x128xbf16>
    %24 = vector.shape_cast %23 : vector<1x24x128xbf16> to vector<24x128xbf16>
    %cst_18 = arith.constant dense<0.000000e+00> : vector<64x128xf32>
    %25 = tpu.matmul %22, %24, %cst_18 {dimension_numbers = #tpu.dot_dimension_numbers<[1], [0], [0], [1], [0, 0, 1, 1], [], []>} : vector<64x24xbf16>, vector<24x128xbf16>, vector<64x128xf32> -> vector<64x128xf32>
    %26 = arith.addf %18, %25 : vector<64x128xf32>
    %c0_19 = arith.constant 0 : index
    %c0_20 = arith.constant 0 : index
    %27 = vector.load %arg4[%c0_19, %c0_20] : memref<1x128xf32, #tpu.memory_space<vmem>>, vector<1x128xf32>
    %28 = vector.broadcast %27 : vector<1x128xf32> to vector<64x128xf32>
    %29 = arith.addf %26, %28 : vector<64x128xf32>
    %cst_21 = arith.constant 0.000000e+00 : f32
    %30 = vector.broadcast %cst_21 : f32 to vector<64x128xf32>
    %31 = arith.maximumf %29, %30 : vector<64x128xf32>
    %32 = vector.shape_cast %31 : vector<64x128xf32> to vector<1x64x128xf32>
    %c0_22 = arith.constant 0 : index
    %c0_23 = arith.constant 0 : index
    %c0_24 = arith.constant 0 : index
    %33 = vector.load %arg5[%c0_22, %c0_23, %c0_24] : memref<1x64x128xf32, #tpu.memory_space<vmem>>, vector<1x64x128xf32>
    tpu.vector_store %arg5[%c0_22, %c0_23, %c0_24], %32 {strides = array<i32>} : memref<1x64x128xf32, #tpu.memory_space<vmem>>, vector<1x64x128xf32>,
    return
  }
  func.func @transform_0(%arg0: i32, %arg1: i32) -> (i32, i32, i32, i32) {
    %c0_i32 = arith.constant 0 : i32
    %c0_i32_0 = arith.constant 0 : i32
    %c0_i32_1 = arith.constant 0 : i32
    %c0_i32_2 = arith.constant 0 : i32
    return %c0_i32, %arg0, %c0_i32_0, %c0_i32_1 : i32, i32, i32, i32
  }
  func.func @transform_1(%arg0: i32, %arg1: i32) -> (i32, i32, i32) {
    %c0_i32 = arith.constant 0 : i32
    %c0_i32_0 = arith.constant 0 : i32
    %c0_i32_1 = arith.constant 0 : i32
    %c0_i32_2 = arith.constant 0 : i32
    return %c0_i32, %c0_i32_0, %c0_i32_1 : i32, i32, i32
  }
  func.func @transform_2(%arg0: i32, %arg1: i32) -> (i32, i32) {
    %c0_i32 = arith.constant 0 : i32
    %c0_i32_0 = arith.constant 0 : i32
    %c0_i32_1 = arith.constant 0 : i32
    return %c0_i32, %c0_i32_0 : i32, i32
  }
  func.func @transform_3(%arg0: i32, %arg1: i32) -> (i32, i32, i32) {
    %c0_i32 = arith.constant 0 : i32
    %c0_i32_0 = arith.constant 0 : i32
    return %arg0, %arg1, %c0_i32 : i32, i32, i32
  }
}

</mosaic_0001>

<bundles_post_ra>
// kernel: conv_batch_norm.1
= control target key start
LH: loop header
LB: loop body
LE: loop exit
PB: predicated region body
PF: predicated region fallthrough
CT: control target
= control target key end

     0   :  { %s1064_s12 = smov 0   ;;  %s1066_s13 = smov 0   ;;  %s1194_s0 = inlined_call_operand.vmem [shape: bf16[2,2,72,24], index: 0, kind: input, shape index: {}]   ;;  %s1195_s1 = inlined_call_operand.vmem [shape: bf16[3,24,128], index: 1, kind: input, shape index: {}]   ;;  %s1196_s2 = inlined_call_operand.vmem [shape: f32[1,128], index: 2, kind: input, shape index: {}]   ;;  %s1197_s3 = inlined_call_operand.vmem [shape: f32[2,64,128], index: 3, kind: output, shape index: {}]  }
   0x1   :  { %s1068_s14 = smov 0   ;;  %s1070_s15 = smov 0  }
   0x2   :  { %s1072_s16 = smov 0  }
   0x3 LB: > { %s25_s17 = sadd.s32 1, %s1038_s15  ;;  %p39_p1 = scmp.ne.s32.totalorder %s1030_s13, %s1026_s12  ;;  %s1042_s16 = sphi %s1072_s16, %s13_s16   ;;  %s1038_s15 = sphi %s1070_s15, %s1201_s15   ;;  %s1034_s14 = sphi %s1068_s14, %s1200_s14   ;;  %s1030_s13 = sphi %s1066_s13, %s1199_s13   ;;  %s1026_s12 = sphi %s1064_s12, %s1198_s12  }
   0x4   : > { %p27_p0 = scmp.ge.s32.totalorder %s25_s17, 2  ;;  %p40_p2 = scmp.eq.s32.totalorder %s1042_s16, 0 }
   0x5   : > { %s32_s19 = sadd.s32 1, %s1030_s13  ;;  %p820_p5 = scmp.ge.s32.totalorder %s1042_s16, 2 }
   0x6   : > { %s1203_s17 = smov (%p27_p0, %s25_s17), 0  ;;  %p41_p3 = por %p40_p2, %p39_p1 }
   0x7   : > { %s29_s18 = ssub.s32 %s1038_s15, %s1203_s17  ;;  %141 = sbr.rel (%p820_p5) target bundleno = 22 (0x16), region = 24 }
   0x8   : > { %p30_p4 = scmp.eq.s32.totalorder %s29_s18, 0 }
   0xa   : > { %s1099_s20 = scalar_select %p30_p4, %s1030_s13, %s32_s19  }
   0xc   : > { %144 = sbr.rel (!%p41_p3) target bundleno = 22 (0x16), region = 28  ;;  %s146_s21 = sand.u32 (%p41_p3), 1, %s1030_s13  }
   0xd   : > { %s944_s22 = smul.u32 (%p41_p3), 36, %s1038_s15 }
   0xe   : > { %s943_s23 = smul.u32 (%p41_p3), 72, %s146_s21 }
   0xf   : > { %s151_s26 = scalar_lea.vmem (%p41_p3), %s1194_s0, %s944_s22 }
  0x10   : > { %v168_v0 = vld [vmem:[%s151_s26] sm:$0xff] (%p41_p3)   ;;  %v172_v1 = vld [vmem:[%s151_s26 + $0x8] sm:$0xff] (%p41_p3)   ;;  %v176_v2 = vld [vmem:[%s151_s26 + $0x10] sm:$0xff] (%p41_p3)   ;;  %s148_s27 = scalar_lea.vmem (%p41_p3), [#allocation2], %s943_s23 }
  0x11   : > { %169 = vst [vmem:[%s148_s27] sm:$0xff] %v168_v0   ;;  %173 = vst [vmem:[%s148_s27 + $0x8] sm:$0xff] %v172_v1   ;;  %v180_v3 = vld [vmem:[%s151_s26 + $0x18] sm:$0xff]   ;;  %v184_v4 = vld [vmem:[%s151_s26 + $0x20] sm:$0xf] }
  0x12   : > { %177 = vst [vmem:[%s148_s27 + $0x10] sm:$0xff] %v176_v2   ;;  %v186_v5 = vld [vmem:[%s151_s26 + $0x48] sm:$0xff]   ;;  %181 = vst [vmem:[%s148_s27 + $0x18] sm:$0xff] %v180_v3   ;;  %v190_v6 = vld [vmem:[%s151_s26 + $0x50] sm:$0xff]  }
  0x13   : > { %185 = vst [vmem:[%s148_s27 + $0x20] sm:$0xf] %v184_v4  ;;  %187 = vst [vmem:[%s148_s27 + $0x24] sm:$0xff] %v186_v5   ;;  %v194_v7 = vld [vmem:[%s151_s26 + $0x58] sm:$0xff]   ;;  %v198_v8 = vld [vmem:[%s151_s26 + $0x60] sm:$0xff]  }
  0x14   : > { %191 = vst [vmem:[%s148_s27 + $0x2c] sm:$0xff] %v190_v6   ;;  %195 = vst [vmem:[%s148_s27 + $0x34] sm:$0xff] %v194_v7   ;;  %v202_v9 = vld [vmem:[%s151_s26 + $0x68] sm:$0xf] }
  0x15   : > { %199 = vst [vmem:[%s148_s27 + $0x3c] sm:$0xff] %v198_v8   ;;  %203 = vst [vmem:[%s148_s27 + $0x44] sm:$0xf] %v202_v9 }
  0x16 PF: > { %p822_p6 = scmp.ge.s32.totalorder %s1042_s16, 1  ;;  %p262_p7 = scmp.lt.s32.totalorder %s1042_s16, 3 }
  0x18   : > { %p263_p8 = pnand %p822_p6, %p262_p7 }
  0x19   : > { %s269_s5 = sand.u32 (!%p263_p8), 1, %s1026_s12   ;;  %p297_p9 = scmp.lt.s32.totalorder (!%p263_p8), %s1034_s14, 1 }
  0x1a   : > { %266 = sbr.rel (%p263_p8) target bundleno = 264 (0x108), region = 69 }
  0x1b   : > { %s945_s6 = smul.u32 (!%p263_p8), 72, %s269_s5 }
  0x1d   : > { %s1125_s11 = scalar_lea.vmem (!%p263_p8), [#allocation2], %s945_s6 }
  0x1f   : > { %v986_v10 = vld [vmem:[%s1195_s1 + $0x14] ss:$0 sps:$4 sm:$0xff]   ;;  %vm380_vm0 = vcmask 1043456   ;;  %v987_v11 = vld [vmem:[%s1195_s1 + $0xc] sm:$0xff]   ;;  %v992_v13 = vld [vmem:[%s1195_s1 + $0x8] ss:$0 sps:$4 sm:$0xff]  }
  0x20   : > { %939 = vmatprep.subr.msk.bf16.mxu0 %vm380_vm0, %v986_v10  ;;  %940 = vmatprep.subr.msk.bf16.mxu1 %vm380_vm0, %v986_v10  ;;  %v382_v12 = vsel %vm380_vm0, %v986_v10, 0  ;;  %v993_v14 = vld [vmem:[%s1195_s1 + $0x20] ss:$0 sps:$4 sm:$0xff]   ;;  %v988_v15 = vld [vmem:[%s1125_s11 + $0x24] sm:$0xff]   ;;  %vm367_vm1 = vcmask 195584   ;;  %v995_v18 = vld [vmem:[%s1195_s1 + $0x18] sm:$0xff]  }
  0x21   : > { %900 = vmatpush3.bf16.msra.mxu0 %v382_v12  ;;  %937 = vmatpush3.bf16.msra.mxu1 %v382_v12  ;;  %v989_v16 = vld [vmem:[%s1125_s11 + $0x34] sm:$0xff]   ;;  %v990_v19 = vld [vmem:[%s1125_s11 + $0x2c] sm:$0xff]   ;;  %v491_v20 = vsel %vm380_vm0, %v992_v13, 0  ;;  %v991_v21 = vld [vmem:[%s1125_s11 + $0x3c] sm:$0xff]   ;;  %v617_v22 = vsel %vm380_vm0, %v993_v14, 0  ;;  %s1205_s14 = smov (!%p297_p9, %s1034_s14), 1 }
  0x22   : > { %901 = vmatprep.subr.bf16.mxu0 %v987_v11  ;;  %936 = vmatprep.subr.bf16.mxu1 %v987_v11  ;;  %v994_v17 = vld [vmem:[%s1195_s1] sm:$0xff]   ;;  %v998_v25 = vld [vmem:[%s1125_s11 + $0x8] sm:$0xff]   ;;  %v1000_v27 = vld [vmem:[%s1125_s11 + $0x10] sm:$0xff]   ;;  %s880_s24 = sshll.u32 %s1205_s14, 6 }
  0x23   : > { %903 = vmatprep.mubr.msk.bf16.mxu0 %vm367_vm1, %v988_v15  ;;  %907 = vmatprep.mubr.msk.bf16.mxu1 %vm367_vm1, %v989_v16  ;;  %v996_v23 = vld [vmem:[%s1125_s11] sm:$0xff]   ;;  %v999_v26 = vld [vmem:[%s1125_s11 + $0xc] sm:$0xff]   ;;  %v1001_v28 = vld [vmem:[%s1125_s11 + $0x14] sm:$0xff]   ;;  %s1169_s27 = scalar_lea.vmem %s1197_s3, %s880_s24 }
  0x24   : > { %v997_v24 = vld [vmem:[%s1125_s11 + $0x4] sm:$0xff]   ;;  %v1002_v29 = vld [vmem:[%s1125_s11 + $0x18] sm:$0xff]  }
  0x25   : > { %902 = vmatpush3.bf16.msra.mxu0 %v987_v11  ;;  %938 = vmatpush3.bf16.msra.mxu1 %v987_v11  ;;  %v1003_v30 = vld [vmem:[%s1125_s11 + $0x1c] sm:$0xff]  }
  0x26   : > { %941 = vmatprep.subr.msk.bf16.mxu1 %vm380_vm0, %v992_v13  ;;  %942 = vmatprep.subr.msk.bf16.mxu0 %vm380_vm0, %v993_v14  ;;  %v877_v42 = vld [vmem:[%s1196_s2] ss:$0 sm:$0xff] }
  0x28   : > { %904 = vmatmul.mubr.msk.bf16.vlgmr.msra.gmra.mxu0 %vm367_vm1, %v990_v19  ;;  %908 = vmatmul.mubr.msk.bf16.vlgmr.msra.gmra.mxu1 %vm367_vm1, %v991_v21 }
  0x29   : > { %912 = vmatpush3.bf16.msra.mxu1 %v491_v20  ;;  %924 = vmatpush3.bf16.msra.mxu0 %v617_v22 }
  0x2a   : > { %913 = vmatprep.subr.bf16.mxu1 %v994_v17  ;;  %925 = vmatprep.subr.bf16.mxu0 %v995_v18 }
  0x2b   : > { %915 = vmatprep.mubr.msk.bf16.mxu1 %vm367_vm1, %v996_v23  ;;  %927 = vmatprep.mubr.msk.bf16.mxu0 %vm367_vm1, %v997_v24 }
  0x2d   : > { %914 = vmatpush3.bf16.msra.mxu1 %v994_v17  ;;  %926 = vmatpush3.bf16.msra.mxu0 %v995_v18 }
  0x30   : > { %916 = vmatmul.mubr.msk.bf16.vlgmr.msra.gmra.mxu1 %vm367_vm1, %v998_v25  ;;  %928 = vmatmul.mubr.msk.bf16.vlgmr.msra.gmra.mxu0 %vm367_vm1, %v999_v26 }
  0x31   : > { %919 = vmatprep.mubr.msk.bf16.mxu1 %vm367_vm1, %v1000_v27  ;;  %931 = vmatprep.mubr.msk.bf16.mxu0 %vm367_vm1, %v1001_v28 }
  0x38   : > { %920 = vmatmul.mubr.msk.bf16.gmra.mxu1 %vm367_vm1, %v1002_v29  ;;  %932 = vmatmul.mubr.msk.bf16.gmra.mxu0 %vm367_vm1, %v1003_v30 }
  0xe8   : > { %v905_v31 = vpop.f32.mrf.mxu0  ;;  %v909_v32 = vpop.f32.mrf.mxu1 }
  0xea   : > { %v418_v33 = vpop.f32.mrf.mxu0  ;;  %v434_v34 = vpop.f32.mrf.mxu1 }
  0xec   : > { %v906_v35 = vpop.f32.mrf.mxu0  ;;  %v910_v36 = vpop.f32.mrf.mxu1 }
  0xee   : > { %v421_v37 = vpop.f32.mrf.mxu0  ;;  %v437_v38 = vpop.f32.mrf.mxu1 }
  0xf0   : > { %v917_v39 = vpop.f32.mrf.mxu1  ;;  %v929_v40 = vpop.f32.mrf.mxu0 }
  0xf1   : > { %v536_v41 = vadd.f32 %v917_v39, %v905_v31 }
  0xf2   : > { %v527_v43 = vpop.f32.mrf.mxu1  ;;  %v653_v44 = vpop.f32.mrf.mxu0 }
  0xf3   : > { %v686_v45 = vadd.f32 %v929_v40, %v536_v41  ;;  %v528_v46 = vadd.f32 %v527_v43, %v418_v33 }
  0xf4   : > { %v918_v47 = vpop.f32.mrf.mxu1  ;;  %v930_v48 = vpop.f32.mrf.mxu0 }
  0xf5   : > { %v701_v49 = vadd.f32 %v877_v42, %v686_v45  ;;  %v684_v50 = vadd.f32 %v653_v44, %v528_v46  ;;  %v539_v51 = vadd.f32 %v918_v47, %v906_v35 }
  0xf6   : > { %v530_v52 = vpop.f32.mrf.mxu1  ;;  %v656_v53 = vpop.f32.mrf.mxu0 }
  0xf7   : > { %v709_v54 = vmax.f32 %v701_v49, 0.0  ;;  %v699_v55 = vadd.f32 %v877_v42, %v684_v50  ;;  %v687_v56 = vadd.f32 %v930_v48, %v539_v51  ;;  %v531_v57 = vadd.f32 %v530_v52, %v421_v37 }
  0xf8   : > { %v921_v58 = vpop.f32.mrf.mxu1  ;;  %v933_v59 = vpop.f32.mrf.mxu0 }
  0xf9   : > { %717 = vst [vmem:[%s1169_s27 + $0x10] sm:$0xff] %v709_v54  ;;  %v707_v60 = vmax.f32 %v699_v55, 0.0  ;;  %v702_v61 = vadd.f32 %v877_v42, %v687_v56  ;;  %v685_v62 = vadd.f32 %v656_v53, %v531_v57  ;;  %v552_v63 = vadd.f32 %v921_v58, %v909_v32 }
  0xfa   : > { %v543_v0 = vpop.f32.mrf.mxu1  ;;  %v669_v1 = vpop.f32.mrf.mxu0 }
  0xfb   : > { %715 = vst [vmem:[%s1169_s27] sm:$0xff] %v707_v60  ;;  %v710_v2 = vmax.f32 %v702_v61, 0.0  ;;  %v700_v3 = vadd.f32 %v877_v42, %v685_v62  ;;  %v690_v4 = vadd.f32 %v933_v59, %v552_v63  ;;  %v544_v5 = vadd.f32 %v543_v0, %v434_v34 }
  0xfc   : > { %v922_v6 = vpop.f32.mrf.mxu1  ;;  %v934_v7 = vpop.f32.mrf.mxu0 }
  0xfd   : > { %718 = vst [vmem:[%s1169_s27 + $0x18] sm:$0xff] %v710_v2  ;;  %v708_v8 = vmax.f32 %v700_v3, 0.0  ;;  %v705_v9 = vadd.f32 %v877_v42, %v690_v4  ;;  %v688_v10 = vadd.f32 %v669_v1, %v544_v5  ;;  %v555_v11 = vadd.f32 %v922_v6, %v910_v36 }
  0xfe   : > { %v546_v12 = vpop.f32.mrf.mxu1  ;;  %v672_v17 = vpop.f32.mrf.mxu0 }
  0xff   : > { %716 = vst [vmem:[%s1169_s27 + $0x8] sm:$0xff] %v708_v8  ;;  %v713_v13 = vmax.f32 %v705_v9, 0.0  ;;  %v703_v14 = vadd.f32 %v877_v42, %v688_v10  ;;  %v691_v15 = vadd.f32 %v934_v7, %v555_v11  ;;  %v547_v16 = vadd.f32 %v546_v12, %v437_v38 }
 0x101   : > { %721 = vst [vmem:[%s1169_s27 + $0x30] sm:$0xff] %v713_v13  ;;  %v711_v18 = vmax.f32 %v703_v14, 0.0  ;;  %v706_v19 = vadd.f32 %v877_v42, %v691_v15  ;;  %v689_v20 = vadd.f32 %v672_v17, %v547_v16 }
 0x103   : > { %719 = vst [vmem:[%s1169_s27 + $0x20] sm:$0xff] %v711_v18  ;;  %v714_v21 = vmax.f32 %v706_v19, 0.0  ;;  %v704_v22 = vadd.f32 %v877_v42, %v689_v20 }
 0x105   : > { %722 = vst [vmem:[%s1169_s27 + $0x38] sm:$0xff] %v714_v21  ;;  %v712_v23 = vmax.f32 %v704_v22, 0.0 }
 0x107   : > { %720 = vst [vmem:[%s1169_s27 + $0x28] sm:$0xff] %v712_v23 }
 0x108 PF: > { %s13_s16 = sadd.s32 1, %s1042_s16   ;;  %s1198_s12 = smov %s1030_s13 }
 0x109   : > { %p10_p10 = scmp.ge.s32.totalorder %s13_s16, 4   ;;  %s1199_s13 = smov %s1099_s20 }
 0x10a   : > { %s1200_s14 = smov %s1038_s15  ;;  %s1201_s15 = smov %s1203_s17 }
 0x10b   :  { %12 = sbr.rel (!%p10_p10) target bundleno = 3 (0x3), region = 113 }

</bundles_post_ra>
